<compile_context>
chip_gen: v7x
topology: tpu7x:2x2x1
jax: 0.10.0
libtpu: 0.0.40
codegen_flags: <defaults>
</compile_context>

<pallas_src>
from functools import partial

import jax
import jax.numpy as jnp
from jax.experimental import pallas as pl
from jax.experimental.pallas import tpu as pltpu


def _lane_shift(v, delta):
    """result[:, c] = v[:, (c + delta) % n] (wrap values are masked by caller)."""
    n = v.shape[1]
    d = delta % n
    if d == 0:
        return v
    return jnp.concatenate([v[:, d:], v[:, :d]], axis=1)


# -----------------------------------------------------------------------------
# Fused kernel: Conv2d(3x3,s1,p1)+bias+ReLU -> MaxPool2d(2,2) -> Flatten(NCHW)
#               -> Linear -> ReLU -> Linear -> (Sigmoid)
# -----------------------------------------------------------------------------
def content_encoder_kernel(xf_ref, wm_ref, cb_ref, mask_ref, sel_ref,
                           w1_ref, b1_ref, w2_ref, b2_ref, o_ref,
                           patch_ref, flat_ref,
                           *, apply_sigmoid, B, H, W):
    Cin = xf_ref.shape[0]
    Cout = wm_ref.shape[0]
    HW = H * W

    xf = xf_ref[...]                                   # (Cin, B*H*W), cols = (b, h, w)

    # --- im2col: build the (9*Cin, B*H*W) patch matrix once in VMEM ----------
    t = 0
    for kh in range(3):
        for kw in range(3):
            delta = (kh - 1) * W + (kw - 1)            # column offset of this tap
            tap = _lane_shift(xf, delta) * mask_ref[t:t + 1, :]   # zero outside pad=1
            patch_ref[t * Cin:(t + 1) * Cin, :] = tap
            t += 1

    # --- conv as one lane-dense MXU matmul + bias + ReLU ---------------------
    acc = jnp.dot(wm_ref[...], patch_ref[...],
                  preferred_element_type=jnp.float32)  # (Cout, B*H*W)
    acc = jnp.maximum(acc + cb_ref[...], 0.0)

    # --- MaxPool2d(2,2): pairwise maxes with shifted copies; the full 2x2
    #     window max lands on columns with even (h, w) -------------------------
    wmax = jnp.maximum(acc, _lane_shift(acc, 1))       # max over w pairs
    hmax = jnp.maximum(wmax, _lane_shift(wmax, W))     # max over h pairs

    # --- gather kept columns per batch (0/1 selection matmul) and lay each
    #     row out in NCHW flatten order (channel-major) on the lanes -----------
    sel = sel_ref[...]                                 # (H*W, Hh*Wh)
    for b in range(B):
        hb = hmax[:, b * HW:(b + 1) * HW]              # (Cout, H*W)
        pooled = jnp.dot(hb, sel,
                         preferred_element_type=jnp.float32)   # (Cout, Hh*Wh)
        flat_ref[b:b + 1, :] = jnp.concatenate(
            [pooled[c:c + 1, :] for c in range(Cout)], axis=1)  # (1, Cout*Hh*Wh)
    flat = flat_ref[...]                               # (B, Cout*Hh*Wh)

    # --- MLP head: Linear -> ReLU -> Linear -> (Sigmoid) ---------------------
    h1 = jnp.dot(flat, w1_ref[...], preferred_element_type=jnp.float32)
    h1 = jnp.maximum(h1 + b1_ref[...], 0.0)
    out = jnp.dot(h1, w2_ref[...], preferred_element_type=jnp.float32)
    out = out + b2_ref[...]
    if apply_sigmoid:                                  # nn.Sigmoid()
        out = jax.nn.sigmoid(out)
    o_ref[...] = out


# -----------------------------------------------------------------------------
# One-time weight / constant layout transforms (done at init, not per forward)
# -----------------------------------------------------------------------------
def prepare_params(params, H, W):
    conv_w = params["conv_w"]                          # (Cout, Cin, 3, 3) OIHW
    Cout, Cin = conv_w.shape[0], conv_w.shape[1]
    Hh, Wh = H // 2, W // 2

    # conv as one matmul: wm[co, (kh*3+kw)*Cin + ci] = conv_w[co, ci, kh, kw]
    wm = jnp.transpose(conv_w, (0, 2, 3, 1)).reshape(Cout, 9 * Cin)
    cb = params["conv_b"].reshape(Cout, 1)

    # per-tap validity masks over the flattened (h, w) columns (tiled per batch
    # in the forward): zero where a 3x3 tap would read outside the pad=1 border.
    h_idx = jnp.arange(H)[:, None]
    w_idx = jnp.arange(W)[None, :]
    masks = []
    for kh in range(3):
        for kw in range(3):
            m = ((h_idx + kh - 1 >= 0) & (h_idx + kh - 1 < H) &
                 (w_idx + kw - 1 >= 0) & (w_idx + kw - 1 < W))
            masks.append(m.reshape(1, H * W))
    tap_mask_hw = jnp.concatenate(masks, axis=0).astype(jnp.float32)   # (9, H*W)

    # 0/1 selection matrix: picks the (even h, even w) columns (where the 2x2
    # window max lives) in (hh, ww) row-major order.
    s = jnp.arange(Hh * Wh)
    keep_col = (2 * (s // Wh)) * W + 2 * (s % Wh)
    sel = (jnp.arange(H * W)[:, None] == keep_col[None, :]).astype(jnp.float32)

    return dict(
        wm=wm, cb=cb, tap_mask_hw=tap_mask_hw, sel=sel,
        w1=params["fc1_w"].T,                  # PyTorch Linear: x @ W.T + b
        b1=params["fc1_b"].reshape(1, -1),
        w2=params["fc2_w"].T,
        b2=params["fc2_b"].reshape(1, -1),
    )


# -----------------------------------------------------------------------------
# ContentEncoder.forward (single fused pallas_call under jit)
# -----------------------------------------------------------------------------
@partial(jax.jit, static_argnames=("sigmoid",))
def content_encoder_forward(x, prepared, sigmoid=True):
    B, Cin, H, W = x.shape
    Dflat = prepared["w1"].shape[0]            # Cout * (H//2) * (W//2)
    Dout = prepared["w2"].shape[1]

    # channel-major with (batch, h, w) flattened onto the lanes: (Cin, B*H*W)
    xf = jnp.transpose(x, (1, 0, 2, 3)).reshape(Cin, B * H * W)
    tap_mask = jnp.tile(prepared["tap_mask_hw"], (1, B))       # (9, B*H*W)

    vmem = pl.BlockSpec(memory_space=pltpu.MemorySpace.VMEM)
    kernel = partial(content_encoder_kernel, apply_sigmoid=sigmoid,
                     B=B, H=H, W=W)
    return pl.pallas_call(
        kernel,
        out_shape=jax.ShapeDtypeStruct((B, Dout), jnp.float32),
        in_specs=[vmem] * 9,
        out_specs=vmem,
        scratch_shapes=[
            pltpu.VMEM((9 * Cin, B * H * W), jnp.float32),     # im2col patches
            pltpu.VMEM((B, Dflat), jnp.float32),               # pooled + flattened
        ],
    )(xf, prepared["wm"], prepared["cb"], tap_mask, prepared["sel"],
      prepared["w1"], prepared["b1"], prepared["w2"], prepared["b2"])


# -----------------------------------------------------------------------------
# Pure-JAX reference (PyTorch semantics) for validation
# -----------------------------------------------------------------------------
def content_encoder_ref(x, params, sigmoid=True):
    y = jax.lax.conv_general_dilated(
        x, params["conv_w"], window_strides=(1, 1), padding=((1, 1), (1, 1)),
        dimension_numbers=("NCHW", "OIHW", "NCHW"))
    y = jnp.maximum(y + params["conv_b"][None, :, None, None], 0.0)
    y = jax.lax.reduce_window(y, -jnp.inf, jax.lax.max,
                              (1, 1, 2, 2), (1, 1, 2, 2), "VALID")
    flat = y.reshape(y.shape[0], -1)
    h = jnp.maximum(flat @ params["fc1_w"].T + params["fc1_b"], 0.0)
    out = h @ params["fc2_w"].T + params["fc2_b"]
    return jax.nn.sigmoid(out) if sigmoid else out


if __name__ == "__main__":
    key = jax.random.PRNGKey(0)
    ks = jax.random.split(key, 7)

    B, Cin, H, W = 2, 4, 16, 16
    Cout = 8
    D_flat = Cout * (H // 2) * (W // 2)   # 512
    H1, Dout = 32, 10

    x = jax.random.normal(ks[0], (B, Cin, H, W), dtype=jnp.float32)
    params = {
        "conv_w": 0.10 * jax.random.normal(ks[1], (Cout, Cin, 3, 3), jnp.float32),
        "conv_b": 0.10 * jax.random.normal(ks[2], (Cout,), jnp.float32),
        "fc1_w": 0.05 * jax.random.normal(ks[3], (H1, D_flat), jnp.float32),
        "fc1_b": 0.05 * jax.random.normal(ks[4], (H1,), jnp.float32),
        "fc2_w": 0.10 * jax.random.normal(ks[5], (Dout, H1), jnp.float32),
        "fc2_b": 0.10 * jax.random.normal(ks[6], (Dout,), jnp.float32),
    }

    prepared = prepare_params(params, H, W)
    out = content_encoder_forward(x, prepared, sigmoid=True)
    jax.block_until_ready(out)

    assert out.shape == (B, Dout) and out.dtype == jnp.float32

    ref = content_encoder_ref(x, params, sigmoid=True)
    err = float(jnp.max(jnp.abs(out - ref)))
    assert err < 5e-3, f"mismatch vs reference: max abs err = {err}"

    print("KERNEL_OK")
</pallas_src>

<mosaic_0001>
module attributes {stable_mosaic.version = 11 : i64} {
  func.func @content_encoder_kernel(%arg0: memref<4x512xf32, #tpu.memory_space<vmem>>, %arg1: memref<8x36xf32, #tpu.memory_space<vmem>>, %arg2: memref<8x1xf32, #tpu.memory_space<vmem>>, %arg3: memref<9x512xf32, #tpu.memory_space<vmem>>, %arg4: memref<256x64xf32, #tpu.memory_space<vmem>>, %arg5: memref<512x32xf32, #tpu.memory_space<vmem>>, %arg6: memref<1x32xf32, #tpu.memory_space<vmem>>, %arg7: memref<32x10xf32, #tpu.memory_space<vmem>>, %arg8: memref<1x10xf32, #tpu.memory_space<vmem>>, %arg9: memref<2x10xf32, #tpu.memory_space<vmem>>, %arg10: memref<36x512xf32, #tpu.memory_space<vmem>>, %arg11: memref<2x512xf32, #tpu.memory_space<vmem>>) attributes {dimension_semantics = [], scalar_prefetch = 0 : i64, scratch_operands = 2 : i64, tpu.core_type = #tpu.core_type<tc>} {
    %c0 = arith.constant 0 : index
    %c0_0 = arith.constant 0 : index
    %0 = vector.load %arg0[%c0, %c0_0] : memref<4x512xf32, #tpu.memory_space<vmem>>, vector<4x512xf32>
    %1 = vector.extract_strided_slice %0 {offsets = [0, 495], sizes = [4, 17], strides = [1, 1]} : vector<4x512xf32> to vector<4x17xf32>
    %2 = vector.extract_strided_slice %0 {offsets = [0, 0], sizes = [4, 495], strides = [1, 1]} : vector<4x512xf32> to vector<4x495xf32>
    %3 = tpu.concatenate %1, %2 in 1 : vector<4x17xf32>, vector<4x495xf32> -> vector<4x512xf32>
    %c0_1 = arith.constant 0 : index
    %c0_2 = arith.constant 0 : index
    %4 = vector.load %arg3[%c0_1, %c0_2] : memref<9x512xf32, #tpu.memory_space<vmem>>, vector<1x512xf32>
    %5 = vector.broadcast %4 : vector<1x512xf32> to vector<4x512xf32>
    %6 = arith.mulf %3, %5 : vector<4x512xf32>
    %c0_3 = arith.constant 0 : index
    %c0_4 = arith.constant 0 : index
    %7 = vector.load %arg10[%c0_3, %c0_4] : memref<36x512xf32, #tpu.memory_space<vmem>>, vector<4x512xf32>
    tpu.vector_store %arg10[%c0_3, %c0_4], %6 {strides = array<i32>} : memref<36x512xf32, #tpu.memory_space<vmem>>, vector<4x512xf32>,
    %8 = vector.extract_strided_slice %0 {offsets = [0, 496], sizes = [4, 16], strides = [1, 1]} : vector<4x512xf32> to vector<4x16xf32>
    %9 = vector.extract_strided_slice %0 {offsets = [0, 0], sizes = [4, 496], strides = [1, 1]} : vector<4x512xf32> to vector<4x496xf32>
    %10 = tpu.concatenate %8, %9 in 1 : vector<4x16xf32>, vector<4x496xf32> -> vector<4x512xf32>
    %c1 = arith.constant 1 : index
    %c0_5 = arith.constant 0 : index
    %11 = vector.load %arg3[%c1, %c0_5] : memref<9x512xf32, #tpu.memory_space<vmem>>, vector<1x512xf32>
    %12 = vector.broadcast %11 : vector<1x512xf32> to vector<4x512xf32>
    %13 = arith.mulf %10, %12 : vector<4x512xf32>
    %c4 = arith.constant 4 : index
    %c0_6 = arith.constant 0 : index
    %14 = vector.load %arg10[%c4, %c0_6] : memref<36x512xf32, #tpu.memory_space<vmem>>, vector<4x512xf32>
    tpu.vector_store %arg10[%c4, %c0_6], %13 {strides = array<i32>} : memref<36x512xf32, #tpu.memory_space<vmem>>, vector<4x512xf32>,
    %15 = vector.extract_strided_slice %0 {offsets = [0, 497], sizes = [4, 15], strides = [1, 1]} : vector<4x512xf32> to vector<4x15xf32>
    %16 = vector.extract_strided_slice %0 {offsets = [0, 0], sizes = [4, 497], strides = [1, 1]} : vector<4x512xf32> to vector<4x497xf32>
    %17 = tpu.concatenate %15, %16 in 1 : vector<4x15xf32>, vector<4x497xf32> -> vector<4x512xf32>
    %c2 = arith.constant 2 : index
    %c0_7 = arith.constant 0 : index
    %18 = vector.load %arg3[%c2, %c0_7] : memref<9x512xf32, #tpu.memory_space<vmem>>, vector<1x512xf32>
    %19 = vector.broadcast %18 : vector<1x512xf32> to vector<4x512xf32>
    %20 = arith.mulf %17, %19 : vector<4x512xf32>
    %c8 = arith.constant 8 : index
    %c0_8 = arith.constant 0 : index
    %21 = vector.load %arg10[%c8, %c0_8] : memref<36x512xf32, #tpu.memory_space<vmem>>, vector<4x512xf32>
    tpu.vector_store %arg10[%c8, %c0_8], %20 {strides = array<i32>} : memref<36x512xf32, #tpu.memory_space<vmem>>, vector<4x512xf32>,
    %22 = vector.extract_strided_slice %0 {offsets = [0, 511], sizes = [4, 1], strides = [1, 1]} : vector<4x512xf32> to vector<4x1xf32>
    %23 = vector.extract_strided_slice %0 {offsets = [0, 0], sizes = [4, 511], strides = [1, 1]} : vector<4x512xf32> to vector<4x511xf32>
    %24 = tpu.concatenate %22, %23 in 1 : vector<4x1xf32>, vector<4x511xf32> -> vector<4x512xf32>
    %c3 = arith.constant 3 : index
    %c0_9 = arith.constant 0 : index
    %25 = vector.load %arg3[%c3, %c0_9] : memref<9x512xf32, #tpu.memory_space<vmem>>, vector<1x512xf32>
    %26 = vector.broadcast %25 : vector<1x512xf32> to vector<4x512xf32>
    %27 = arith.mulf %24, %26 : vector<4x512xf32>
    %c12 = arith.constant 12 : index
    %c0_10 = arith.constant 0 : index
    %28 = vector.load %arg10[%c12, %c0_10] : memref<36x512xf32, #tpu.memory_space<vmem>>, vector<4x512xf32>
    tpu.vector_store %arg10[%c12, %c0_10], %27 {strides = array<i32>} : memref<36x512xf32, #tpu.memory_space<vmem>>, vector<4x512xf32>,
    %c4_11 = arith.constant 4 : index
    %c0_12 = arith.constant 0 : index
    %29 = vector.load %arg3[%c4_11, %c0_12] : memref<9x512xf32, #tpu.memory_space<vmem>>, vector<1x512xf32>
    %30 = vector.broadcast %29 : vector<1x512xf32> to vector<4x512xf32>
    %31 = arith.mulf %0, %30 : vector<4x512xf32>
    %c16 = arith.constant 16 : index
    %c0_13 = arith.constant 0 : index
    %32 = vector.load %arg10[%c16, %c0_13] : memref<36x512xf32, #tpu.memory_space<vmem>>, vector<4x512xf32>
    tpu.vector_store %arg10[%c16, %c0_13], %31 {strides = array<i32>} : memref<36x512xf32, #tpu.memory_space<vmem>>, vector<4x512xf32>,
    %33 = vector.extract_strided_slice %0 {offsets = [0, 1], sizes = [4, 511], strides = [1, 1]} : vector<4x512xf32> to vector<4x511xf32>
    %34 = vector.extract_strided_slice %0 {offsets = [0, 0], sizes = [4, 1], strides = [1, 1]} : vector<4x512xf32> to vector<4x1xf32>
    %35 = tpu.concatenate %33, %34 in 1 : vector<4x511xf32>, vector<4x1xf32> -> vector<4x512xf32>
    %c5 = arith.constant 5 : index
    %c0_14 = arith.constant 0 : index
    %36 = vector.load %arg3[%c5, %c0_14] : memref<9x512xf32, #tpu.memory_space<vmem>>, vector<1x512xf32>
    %37 = vector.broadcast %36 : vector<1x512xf32> to vector<4x512xf32>
    %38 = arith.mulf %35, %37 : vector<4x512xf32>
    %c20 = arith.constant 20 : index
    %c0_15 = arith.constant 0 : index
    %39 = vector.load %arg10[%c20, %c0_15] : memref<36x512xf32, #tpu.memory_space<vmem>>, vector<4x512xf32>
    tpu.vector_store %arg10[%c20, %c0_15], %38 {strides = array<i32>} : memref<36x512xf32, #tpu.memory_space<vmem>>, vector<4x512xf32>,
    %40 = vector.extract_strided_slice %0 {offsets = [0, 15], sizes = [4, 497], strides = [1, 1]} : vector<4x512xf32> to vector<4x497xf32>
    %41 = vector.extract_strided_slice %0 {offsets = [0, 0], sizes = [4, 15], strides = [1, 1]} : vector<4x512xf32> to vector<4x15xf32>
    %42 = tpu.concatenate %40, %41 in 1 : vector<4x497xf32>, vector<4x15xf32> -> vector<4x512xf32>
    %c6 = arith.constant 6 : index
    %c0_16 = arith.constant 0 : index
    %43 = vector.load %arg3[%c6, %c0_16] : memref<9x512xf32, #tpu.memory_space<vmem>>, vector<1x512xf32>
    %44 = vector.broadcast %43 : vector<1x512xf32> to vector<4x512xf32>
    %45 = arith.mulf %42, %44 : vector<4x512xf32>
    %c24 = arith.constant 24 : index
    %c0_17 = arith.constant 0 : index
    %46 = vector.load %arg10[%c24, %c0_17] : memref<36x512xf32, #tpu.memory_space<vmem>>, vector<4x512xf32>
    tpu.vector_store %arg10[%c24, %c0_17], %45 {strides = array<i32>} : memref<36x512xf32, #tpu.memory_space<vmem>>, vector<4x512xf32>,
    %47 = vector.extract_strided_slice %0 {offsets = [0, 16], sizes = [4, 496], strides = [1, 1]} : vector<4x512xf32> to vector<4x496xf32>
    %48 = vector.extract_strided_slice %0 {offsets = [0, 0], sizes = [4, 16], strides = [1, 1]} : vector<4x512xf32> to vector<4x16xf32>
    %49 = tpu.concatenate %47, %48 in 1 : vector<4x496xf32>, vector<4x16xf32> -> vector<4x512xf32>
    %c7 = arith.constant 7 : index
    %c0_18 = arith.constant 0 : index
    %50 = vector.load %arg3[%c7, %c0_18] : memref<9x512xf32, #tpu.memory_space<vmem>>, vector<1x512xf32>
    %51 = vector.broadcast %50 : vector<1x512xf32> to vector<4x512xf32>
    %52 = arith.mulf %49, %51 : vector<4x512xf32>
    %c28 = arith.constant 28 : index
    %c0_19 = arith.constant 0 : index
    %53 = vector.load %arg10[%c28, %c0_19] : memref<36x512xf32, #tpu.memory_space<vmem>>, vector<4x512xf32>
    tpu.vector_store %arg10[%c28, %c0_19], %52 {strides = array<i32>} : memref<36x512xf32, #tpu.memory_space<vmem>>, vector<4x512xf32>,
    %54 = vector.extract_strided_slice %0 {offsets = [0, 17], sizes = [4, 495], strides = [1, 1]} : vector<4x512xf32> to vector<4x495xf32>
    %55 = vector.extract_strided_slice %0 {offsets = [0, 0], sizes = [4, 17], strides = [1, 1]} : vector<4x512xf32> to vector<4x17xf32>
    %56 = tpu.concatenate %54, %55 in 1 : vector<4x495xf32>, vector<4x17xf32> -> vector<4x512xf32>
    %c8_20 = arith.constant 8 : index
    %c0_21 = arith.constant 0 : index
    %57 = vector.load %arg3[%c8_20, %c0_21] : memref<9x512xf32, #tpu.memory_space<vmem>>, vector<1x512xf32>
    %58 = vector.broadcast %57 : vector<1x512xf32> to vector<4x512xf32>
    %59 = arith.mulf %56, %58 : vector<4x512xf32>
    %c32 = arith.constant 32 : index
    %c0_22 = arith.constant 0 : index
    %60 = vector.load %arg10[%c32, %c0_22] : memref<36x512xf32, #tpu.memory_space<vmem>>, vector<4x512xf32>
    tpu.vector_store %arg10[%c32, %c0_22], %59 {strides = array<i32>} : memref<36x512xf32, #tpu.memory_space<vmem>>, vector<4x512xf32>,
    %c0_23 = arith.constant 0 : index
    %c0_24 = arith.constant 0 : index
    %61 = vector.load %arg1[%c0_23, %c0_24] : memref<8x36xf32, #tpu.memory_space<vmem>>, vector<8x36xf32>
    %c0_25 = arith.constant 0 : index
    %c0_26 = arith.constant 0 : index
    %62 = vector.load %arg10[%c0_25, %c0_26] : memref<36x512xf32, #tpu.memory_space<vmem>>, vector<36x512xf32>
    %cst = arith.constant dense<0.000000e+00> : vector<8x512xf32>
    %63 = tpu.matmul %61, %62, %cst {dimension_numbers = #tpu.dot_dimension_numbers<[1], [0], [0], [1], [0, 0, 1, 1], [], []>} : vector<8x36xf32>, vector<36x512xf32>, vector<8x512xf32> -> vector<8x512xf32>
    %c0_27 = arith.constant 0 : index
    %c0_28 = arith.constant 0 : index
    %64 = vector.load %arg2[%c0_27, %c0_28] : memref<8x1xf32, #tpu.memory_space<vmem>>, vector<8x1xf32>
    %65 = vector.broadcast %64 : vector<8x1xf32> to vector<8x512xf32>
    %66 = arith.addf %63, %65 : vector<8x512xf32>
    %cst_29 = arith.constant 0.000000e+00 : f32
    %67 = vector.broadcast %cst_29 : f32 to vector<8x512xf32>
    %68 = arith.maximumf %66, %67 : vector<8x512xf32>
    %69 = vector.extract_strided_slice %68 {offsets = [0, 1], sizes = [8, 511], strides = [1, 1]} : vector<8x512xf32> to vector<8x511xf32>
    %70 = vector.extract_strided_slice %68 {offsets = [0, 0], sizes = [8, 1], strides = [1, 1]} : vector<8x512xf32> to vector<8x1xf32>
    %71 = tpu.concatenate %69, %70 in 1 : vector<8x511xf32>, vector<8x1xf32> -> vector<8x512xf32>
    %72 = arith.maximumf %68, %71 : vector<8x512xf32>
    %73 = vector.extract_strided_slice %72 {offsets = [0, 16], sizes = [8, 496], strides = [1, 1]} : vector<8x512xf32> to vector<8x496xf32>
    %74 = vector.extract_strided_slice %72 {offsets = [0, 0], sizes = [8, 16], strides = [1, 1]} : vector<8x512xf32> to vector<8x16xf32>
    %75 = tpu.concatenate %73, %74 in 1 : vector<8x496xf32>, vector<8x16xf32> -> vector<8x512xf32>
    %76 = arith.maximumf %72, %75 : vector<8x512xf32>
    %c0_30 = arith.constant 0 : index
    %c0_31 = arith.constant 0 : index
    %77 = vector.load %arg4[%c0_30, %c0_31] : memref<256x64xf32, #tpu.memory_space<vmem>>, vector<256x64xf32>
    %78 = vector.extract_strided_slice %76 {offsets = [0, 0], sizes = [8, 256], strides = [1, 1]} : vector<8x512xf32> to vector<8x256xf32>
    %cst_32 = arith.constant dense<0.000000e+00> : vector<8x64xf32>
    %79 = tpu.matmul %78, %77, %cst_32 {dimension_numbers = #tpu.dot_dimension_numbers<[1], [0], [0], [1], [0, 0, 1, 1], [], []>} : vector<8x256xf32>, vector<256x64xf32>, vector<8x64xf32> -> vector<8x64xf32>
    %80 = vector.extract_strided_slice %79 {offsets = [0, 0], sizes = [1, 64], strides = [1, 1]} : vector<8x64xf32> to vector<1x64xf32>
    %81 = vector.extract_strided_slice %79 {offsets = [1, 0], sizes = [1, 64], strides = [1, 1]} : vector<8x64xf32> to vector<1x64xf32>
    %82 = vector.extract_strided_slice %79 {offsets = [2, 0], sizes = [1, 64], strides = [1, 1]} : vector<8x64xf32> to vector<1x64xf32>
    %83 = vector.extract_strided_slice %79 {offsets = [3, 0], sizes = [1, 64], strides = [1, 1]} : vector<8x64xf32> to vector<1x64xf32>
    %84 = vector.extract_strided_slice %79 {offsets = [4, 0], sizes = [1, 64], strides = [1, 1]} : vector<8x64xf32> to vector<1x64xf32>
    %85 = vector.extract_strided_slice %79 {offsets = [5, 0], sizes = [1, 64], strides = [1, 1]} : vector<8x64xf32> to vector<1x64xf32>
    %86 = vector.extract_strided_slice %79 {offsets = [6, 0], sizes = [1, 64], strides = [1, 1]} : vector<8x64xf32> to vector<1x64xf32>
    %87 = vector.extract_strided_slice %79 {offsets = [7, 0], sizes = [1, 64], strides = [1, 1]} : vector<8x64xf32> to vector<1x64xf32>
    %88 = tpu.concatenate %80, %81, %82, %83, %84, %85, %86, %87 in 1 : vector<1x64xf32>, vector<1x64xf32>, vector<1x64xf32>, vector<1x64xf32>, vector<1x64xf32>, vector<1x64xf32>, vector<1x64xf32>, vector<1x64xf32> -> vector<1x512xf32>
    %c0_33 = arith.constant 0 : index
    %c0_34 = arith.constant 0 : index
    %89 = vector.load %arg11[%c0_33, %c0_34] : memref<2x512xf32, #tpu.memory_space<vmem>>, vector<1x512xf32>
    tpu.vector_store %arg11[%c0_33, %c0_34], %88 {strides = array<i32>} : memref<2x512xf32, #tpu.memory_space<vmem>>, vector<1x512xf32>,
    %90 = vector.extract_strided_slice %76 {offsets = [0, 256], sizes = [8, 256], strides = [1, 1]} : vector<8x512xf32> to vector<8x256xf32>
    %cst_35 = arith.constant dense<0.000000e+00> : vector<8x64xf32>
    %91 = tpu.matmul %90, %77, %cst_35 {dimension_numbers = #tpu.dot_dimension_numbers<[1], [0], [0], [1], [0, 0, 1, 1], [], []>} : vector<8x256xf32>, vector<256x64xf32>, vector<8x64xf32> -> vector<8x64xf32>
    %92 = vector.extract_strided_slice %91 {offsets = [0, 0], sizes = [1, 64], strides = [1, 1]} : vector<8x64xf32> to vector<1x64xf32>
    %93 = vector.extract_strided_slice %91 {offsets = [1, 0], sizes = [1, 64], strides = [1, 1]} : vector<8x64xf32> to vector<1x64xf32>
    %94 = vector.extract_strided_slice %91 {offsets = [2, 0], sizes = [1, 64], strides = [1, 1]} : vector<8x64xf32> to vector<1x64xf32>
    %95 = vector.extract_strided_slice %91 {offsets = [3, 0], sizes = [1, 64], strides = [1, 1]} : vector<8x64xf32> to vector<1x64xf32>
    %96 = vector.extract_strided_slice %91 {offsets = [4, 0], sizes = [1, 64], strides = [1, 1]} : vector<8x64xf32> to vector<1x64xf32>
    %97 = vector.extract_strided_slice %91 {offsets = [5, 0], sizes = [1, 64], strides = [1, 1]} : vector<8x64xf32> to vector<1x64xf32>
    %98 = vector.extract_strided_slice %91 {offsets = [6, 0], sizes = [1, 64], strides = [1, 1]} : vector<8x64xf32> to vector<1x64xf32>
    %99 = vector.extract_strided_slice %91 {offsets = [7, 0], sizes = [1, 64], strides = [1, 1]} : vector<8x64xf32> to vector<1x64xf32>
    %100 = tpu.concatenate %92, %93, %94, %95, %96, %97, %98, %99 in 1 : vector<1x64xf32>, vector<1x64xf32>, vector<1x64xf32>, vector<1x64xf32>, vector<1x64xf32>, vector<1x64xf32>, vector<1x64xf32>, vector<1x64xf32> -> vector<1x512xf32>
    %c1_36 = arith.constant 1 : index
    %c0_37 = arith.constant 0 : index
    %101 = vector.load %arg11[%c1_36, %c0_37] : memref<2x512xf32, #tpu.memory_space<vmem>>, vector<1x512xf32>
    tpu.vector_store %arg11[%c1_36, %c0_37], %100 {strides = array<i32>} : memref<2x512xf32, #tpu.memory_space<vmem>>, vector<1x512xf32>,
    %c0_38 = arith.constant 0 : index
    %c0_39 = arith.constant 0 : index
    %102 = vector.load %arg11[%c0_38, %c0_39] : memref<2x512xf32, #tpu.memory_space<vmem>>, vector<2x512xf32>
    %c0_40 = arith.constant 0 : index
    %c0_41 = arith.constant 0 : index
    %103 = vector.load %arg5[%c0_40, %c0_41] : memref<512x32xf32, #tpu.memory_space<vmem>>, vector<512x32xf32>
    %cst_42 = arith.constant dense<0.000000e+00> : vector<2x32xf32>
    %104 = tpu.matmul %102, %103, %cst_42 {dimension_numbers = #tpu.dot_dimension_numbers<[1], [0], [0], [1], [0, 0, 1, 1], [], []>} : vector<2x512xf32>, vector<512x32xf32>, vector<2x32xf32> -> vector<2x32xf32>
    %c0_43 = arith.constant 0 : index
    %c0_44 = arith.constant 0 : index
    %105 = vector.load %arg6[%c0_43, %c0_44] : memref<1x32xf32, #tpu.memory_space<vmem>>, vector<1x32xf32>
    %106 = vector.broadcast %105 : vector<1x32xf32> to vector<2x32xf32>
    %107 = arith.addf %104, %106 : vector<2x32xf32>
    %cst_45 = arith.constant 0.000000e+00 : f32
    %108 = vector.broadcast %cst_45 : f32 to vector<2x32xf32>
    %109 = arith.maximumf %107, %108 : vector<2x32xf32>
    %c0_46 = arith.constant 0 : index
    %c0_47 = arith.constant 0 : index
    %110 = vector.load %arg7[%c0_46, %c0_47] : memref<32x10xf32, #tpu.memory_space<vmem>>, vector<32x10xf32>
    %cst_48 = arith.constant dense<0.000000e+00> : vector<2x10xf32>
    %111 = tpu.matmul %109, %110, %cst_48 {dimension_numbers = #tpu.dot_dimension_numbers<[1], [0], [0], [1], [0, 0, 1, 1], [], []>} : vector<2x32xf32>, vector<32x10xf32>, vector<2x10xf32> -> vector<2x10xf32>
    %c0_49 = arith.constant 0 : index
    %c0_50 = arith.constant 0 : index
    %112 = vector.load %arg8[%c0_49, %c0_50] : memref<1x10xf32, #tpu.memory_space<vmem>>, vector<1x10xf32>
    %113 = vector.broadcast %112 : vector<1x10xf32> to vector<2x10xf32>
    %114 = arith.addf %111, %113 : vector<2x10xf32>
    %115 = arith.negf %114 : vector<2x10xf32>
    %116 = math.exp %115 : vector<2x10xf32>
    %cst_51 = arith.constant 1.000000e+00 : f32
    %117 = vector.broadcast %cst_51 : f32 to vector<2x10xf32>
    %118 = arith.addf %117, %116 : vector<2x10xf32>
    %119 = arith.divf %117, %118 : vector<2x10xf32>
    %c0_52 = arith.constant 0 : index
    %c0_53 = arith.constant 0 : index
    %120 = vector.load %arg9[%c0_52, %c0_53] : memref<2x10xf32, #tpu.memory_space<vmem>>, vector<2x10xf32>
    tpu.vector_store %arg9[%c0_52, %c0_53], %119 {strides = array<i32>} : memref<2x10xf32, #tpu.memory_space<vmem>>, vector<2x10xf32>,
    return
  }
}

</mosaic_0001>

<bundles_post_ra>
// kernel: content_encoder_forward.1
= control target key start
LH: loop header
LB: loop body
LE: loop exit
PB: predicated region body
PF: predicated region fallthrough
CT: control target
= control target key end

     0   :  { %s1779_s13 = smov 16   ;;  %s2392_s0 = inlined_call_operand.vmem [shape: f32[4,512], index: 0, kind: input, shape index: {}]   ;;  %s2393_s1 = inlined_call_operand.vmem [shape: f32[8,36], index: 1, kind: input, shape index: {}]   ;;  %s2394_s2 = inlined_call_operand.vmem [shape: f32[8,1], index: 2, kind: input, shape index: {}]   ;;  %s2395_s3 = inlined_call_operand.vmem [shape: f32[9,512], index: 3, kind: input, shape index: {}]   ;;  %s2396_s4 = inlined_call_operand.vmem [shape: f32[256,64], index: 4, kind: input, shape index: {}]   ;;  %s2397_s5 = inlined_call_operand.vmem [shape: f32[512,32], index: 5, kind: input, shape index: {}]   ;;  %s2398_s6 = inlined_call_operand.vmem [shape: f32[1,32], index: 6, kind: input, shape index: {}]   ;;  %s2399_s7 = inlined_call_operand.vmem [shape: f32[32,10], index: 7, kind: input, shape index: {}]   ;;  %s2400_s8 = inlined_call_operand.vmem [shape: f32[1,10], index: 8, kind: input, shape index: {}]   ;;  %s2401_s9 = inlined_call_operand.hbm [shape: f32[2,10], index: 9, kind: output, shape index: {}]  }
   0x1   :  { %v1848_v0 = vld [vmem:[%s2392_s0 + $0x8] sm:$0xff]  ;;  %v33_v1 = vld [vmem:[%s2392_s0] sm:$0xff] }
   0x2   :  { %v36_v2 = vcombine.high %v1848_v0, %v1848_v0  ;;  %v41_v3 = vcombine.high %v33_v1, %v33_v1 }
   0x4   :  { %87 = vrot.lane.b32.xlu0 %v36_v2, %s1779_s13  ;;  %92 = vrot.lane.b32.xlu1 %v41_v3, %s1779_s13 }
   0x5   :  { %14 = vsyncpa [#allocation5], 0  ;;  %s1780_s14 = smov 1   ;;  %v59_v4 = vlaneseq  ;;  %s1781_s0 = smov 17   ;;  %v1787_v21 = vmov 0.0   ;;  %v534_v22 = vld [vmem:[%s2394_s2] sm:$0xff] }
   0x6   :  { %v1390_v8 = vld [vmem:[%s2395_s3 + $0x4] ss:$8 sm:$0xf]  ;;  %s1782_s17 = smov 15   ;;  %s1783_s18 = smov 127   ;;  %621 = vmatprep.mubr.f32.mxu0 %v1787_v21  ;;  %692 = vmatprep.mubr.f32.mxu1 %v1787_v21  ;;  %v1788_v23 = vmov 0  }
   0x7   :  { %v1858_v5 = vshrl.u32 %v59_v4, 7  ;;  %s1784_s19 = smov 112   ;;  %s1785_s20 = smov 113   ;;  %1727 = vset.pattern.permute.xlu0 %v1788_v23  ;;  %v1387_v24 = vld [vmem:[%s2395_s3 + $0x1] ss:$8 sm:$0xf] }
   0x8   :  { %90 = vrot.lane.b32.xlu0 %v33_v1, %s1779_s13  ;;  %94 = vrot.lane.b32.xlu1 %v1848_v0, %s1779_s13  ;;  %s1786_s21 = smov 111   ;;  %vm96_vm0 = vcmask 130048   ;;  %v1389_v27 = vld [vmem:[%s2395_s3 + $0x3] ss:$8 sm:$0xf]  ;;  %vm206_vm1 = vcmask 7168  }
   0x9   :  { %v1861_v6 = vsub.s32 0, %v1858_v5  ;;  %v1864_v7 = vsub.s32 1, %v1858_v5  ;;  %v1870_v9 = vsub.s32 2, %v1858_v5  ;;  %v1873_v10 = vsub.s32 3, %v1858_v5  ;;  %s1789_s27 = smov 64  }
   0xa   :  { %v57_v54 = vld [vmem:[%s2395_s3] ss:$8 sm:$0xf]  ;;  %vm48_vm2 = vcmask 138240   ;;  %vm157_vm3 = vcmask 121856   ;;  %vm301_vm4 = vcmask 1039360  }
   0xb   :  { %v264_v11 = vrot.slane %v1390_v8, %v1861_v6  ;;  %v268_v12 = vrot.slane %v1390_v8, %v1864_v7  ;;  %v272_v14 = vrot.slane %v1390_v8, %v1870_v9  ;;  %v276_v15 = vrot.slane %v1390_v8, %v1873_v10 }
   0xc   :  { %197 = vrot.lane.b32.xlu0 %v36_v2, %s1780_s14  ;;  %200 = vrot.lane.b32.xlu1 %v33_v1, %s1780_s14  ;;  %v111_v28 = vrot.slane %v1387_v24, %v1861_v6  ;;  %v115_v29 = vrot.slane %v1387_v24, %v1864_v7  ;;  %v119_v30 = vrot.slane %v1387_v24, %v1870_v9  ;;  %vm411_vm5 = vcmask 916480  }
   0xd   :  { %v277_v13 = vcombine.low %v264_v11, %v268_v12  ;;  %v278_v17 = vcombine.low %v272_v14, %v276_v15  ;;  %v123_v31 = vrot.slane %v1387_v24, %v1873_v10  ;;  %v221_v34 = vrot.slane %v1389_v27, %v1861_v6 }
   0xe   :  { %v225_v51 = vrot.slane %v1389_v27, %v1864_v7  ;;  %v229_v52 = vrot.slane %v1389_v27, %v1870_v9  ;;  %v233_v53 = vrot.slane %v1389_v27, %v1873_v10  ;;  %v66_v14 = vrot.slane %v57_v54, %v1864_v7 }
   0xf   :  { %v281_v16 = vmul.f32 %v277_v13, %v33_v1  ;;  %v282_v18 = vmul.f32 %v278_v17, %v1848_v0  ;;  %v70_v15 = vrot.slane %v57_v54, %v1870_v9  ;;  %v1388_v17 = vld [vmem:[%s2395_s3 + $0x2] ss:$8 sm:$0xf]  ;;  %vm362_vm6 = vcmask 924672  }
  0x10   :  { %202 = vrot.lane.b32.xlu0 %v41_v3, %s1780_s14  ;;  %204 = vrot.lane.b32.xlu1 %v1848_v0, %s1780_s14  ;;  %v172_v27 = vrot.slane %v1388_v17, %v1861_v6  ;;  %vm472_vm7 = vcmask 908288   ;;  %vm544_vm8 = vcmask 1043456   ;;  %vm540_vm9 = vcmask 293888  }
  0x11   :  { %289 = vst [vmem:[#allocation2 + $0x40] sm:$0xf] %v281_v16  ;;  %v285_v19 = vcombine.high %v281_v16, %v281_v16  ;;  %v286_v20 = vcombine.high %v282_v18, %v282_v18  ;;  %291 = vst [vmem:[#allocation2 + $0x50] sm:$0xf] %v282_v18  ;;  %v74_v16 = vrot.slane %v57_v54, %v1873_v10  ;;  %vm878_vm10 = vcmask 523264  }
  0x12   :  { %vm2348_vm11 = vcmp.lt.s32.totalorder %v59_v4, 512  ;;  %vm1793_vm12 = vmmov 0   ;;  %vm1291_vm13 = vcmask 261120   ;;  %vm1371_vm14 = vcmask 74752  }
  0x13   :  { %290 = vst [vmem:[#allocation2 + $0x48] sm:$0xf] %v285_v19  ;;  %292 = vst [vmem:[#allocation2 + $0x58] sm:$0xf] %v286_v20 }
  0x14   :  { %37 = vrot.lane.b32.xlu0 %v36_v2, %s1781_s0  ;;  %42 = vrot.lane.b32.xlu1 %v33_v1, %s1781_s0 }
  0x18   :  { %44 = vrot.lane.b32.xlu0 %v41_v3, %s1781_s0  ;;  %46 = vrot.lane.b32.xlu1 %v1848_v0, %s1781_s0 }
  0x1c   :  { %148 = vrot.lane.b32.xlu0 %v36_v2, %s1782_s17  ;;  %151 = vrot.lane.b32.xlu1 %v33_v1, %s1782_s17 }
  0x20   :  { %153 = vrot.lane.b32.xlu0 %v41_v3, %s1782_s17  ;;  %155 = vrot.lane.b32.xlu1 %v1848_v0, %s1782_s17 }
  0x24   :  { %293 = vrot.lane.b32.xlu0 %v33_v1, %s1783_s18  ;;  %295 = vrot.lane.b32.xlu1 %v41_v3, %s1783_s18 }
  0x28   :  { %297 = vrot.lane.b32.xlu0 %v1848_v0, %s1783_s18  ;;  %299 = vrot.lane.b32.xlu1 %v36_v2, %s1783_s18 }
  0x2c   :  { %403 = vrot.lane.b32.xlu0 %v33_v1, %s1784_s19  ;;  %405 = vrot.lane.b32.xlu1 %v41_v3, %s1784_s19 }
  0x30   :  { %407 = vrot.lane.b32.xlu0 %v1848_v0, %s1784_s19  ;;  %409 = vrot.lane.b32.xlu1 %v36_v2, %s1784_s19 }
  0x34   :  { %354 = vrot.lane.b32.xlu0 %v33_v1, %s1785_s20  ;;  %356 = vrot.lane.b32.xlu1 %v41_v3, %s1785_s20 }
  0x38   :  { %358 = vrot.lane.b32.xlu0 %v1848_v0, %s1785_s20  ;;  %360 = vrot.lane.b32.xlu1 %v36_v2, %s1785_s20 }
  0x3c   :  { %464 = vrot.lane.b32.xlu0 %v33_v1, %s1786_s21  ;;  %466 = vrot.lane.b32.xlu1 %v41_v3, %s1786_s21 }
  0x40   :  { %468 = vrot.lane.b32.xlu0 %v1848_v0, %s1786_s21  ;;  %470 = vrot.lane.b32.xlu1 %v36_v2, %s1786_s21  ;;  %v62_v0 = vrot.slane %v57_v54, %v1861_v6 }
  0x44   :  { %537 = vperm.xlu0 %1727, %v534_v22  }
  0x76   :  { %v88_v25 = vpop.permute.xlu0 %87  ;;  %v93_v26 = vpop.permute.xlu1 %92 }
  0x7a   :  { %v91_v32 = vpop.permute.xlu0 %90  ;;  %v95_v33 = vpop.permute.xlu1 %94 }
  0x7b   :  { %v97_v35 = vsel %vm96_vm0, %v91_v32, %v93_v26  ;;  %v104_v36 = vsel %vm96_vm0, %v88_v25, %v91_v32  ;;  %v98_v37 = vsel %vm96_vm0, %v93_v26, %v95_v33  ;;  %v99_v38 = vsel %vm96_vm0, %v95_v33, %v88_v25 }
  0x7c   :  { %v128_v39 = vmul.f32 %v111_v28, %v104_v36  ;;  %v129_v40 = vmul.f32 %v115_v29, %v97_v35  ;;  %v130_v41 = vmul.f32 %v119_v30, %v98_v37  ;;  %v131_v42 = vmul.f32 %v123_v31, %v99_v38  ;;  %v1391_v35 = vld [vmem:[%s2395_s3 + $0x5] ss:$8 sm:$0xf] }
  0x7d   :  { %v176_v32 = vrot.slane %v1388_v17, %v1864_v7  ;;  %v180_v33 = vrot.slane %v1388_v17, %v1870_v9 }
  0x7e   :  { %v136_v43 = vrot.slane %v128_v39, 4  ;;  %v137_v44 = vrot.slane %v129_v40, 4  ;;  %v138_v45 = vrot.slane %v130_v41, 4  ;;  %v139_v46 = vrot.slane %v131_v42, 4  ;;  %v198_v47 = vpop.permute.xlu0 %197  ;;  %v201_v48 = vpop.permute.xlu1 %200 }
  0x7f   :  { %v214_v49 = vsel %vm206_vm1, %v198_v47, %v201_v48 }
  0x80   :  { %144 = vst [vmem:[#allocation2] sm:$0xf0] %v136_v43  ;;  %145 = vst [vmem:[#allocation2 + $0x8] sm:$0xf0] %v137_v44  ;;  %v238_v50 = vmul.f32 %v221_v34, %v214_v49  ;;  %v184_v34 = vrot.slane %v1388_v17, %v1873_v10  ;;  %v317_v44 = vrot.slane %v1391_v35, %v1861_v6 }
  0x81   :  { %146 = vst [vmem:[#allocation2 + $0x10] sm:$0xf0] %v138_v45  ;;  %147 = vst [vmem:[#allocation2 + $0x18] sm:$0xf0] %v139_v46  ;;  %v321_v49 = vrot.slane %v1391_v35, %v1864_v7 }
  0x82   :  { %v246_v55 = vrot.slane %v238_v50, 4  ;;  %v203_v56 = vpop.permute.xlu0 %202  ;;  %v205_v57 = vpop.permute.xlu1 %204  ;;  %v325_v50 = vrot.slane %v1391_v35, %v1870_v9 }
  0x83   :  { %v207_v58 = vsel %vm206_vm1, %v201_v48, %v203_v56  ;;  %v208_v59 = vsel %vm206_vm1, %v203_v56, %v205_v57  ;;  %v209_v60 = vsel %vm206_vm1, %v205_v57, %v198_v47 }
  0x84   :  { %254 = vst [vmem:[#allocation2 + $0x20] sm:$0xf0] %v246_v55  ;;  %v239_v61 = vmul.f32 %v225_v51, %v207_v58  ;;  %v240_v62 = vmul.f32 %v229_v52, %v208_v59  ;;  %v241_v63 = vmul.f32 %v233_v53, %v209_v60  ;;  %v329_v51 = vrot.slane %v1391_v35, %v1873_v10  ;;  %v1393_v52 = vld [vmem:[%s2395_s3 + $0x7] ss:$8 sm:$0xf] }
  0x86   :  { %v247_v1 = vrot.slane %v239_v61, 4  ;;  %v248_v2 = vrot.slane %v240_v62, 4  ;;  %v249_v3 = vrot.slane %v241_v63, 4  ;;  %v38_v8 = vpop.permute.xlu0 %37  ;;  %v43_v11 = vpop.permute.xlu1 %42  ;;  %v427_v62 = vrot.slane %v1393_v52, %v1861_v6 }
  0x87   :  { %v56_v12 = vsel %vm48_vm2, %v38_v8, %v43_v11 }
  0x88   :  { %255 = vst [vmem:[#allocation2 + $0x28] sm:$0xf0] %v247_v1  ;;  %256 = vst [vmem:[#allocation2 + $0x30] sm:$0xf0] %v248_v2  ;;  %v79_v13 = vmul.f32 %v62_v0, %v56_v12 }
  0x89   :  { %257 = vst [vmem:[#allocation2 + $0x38] sm:$0xf0] %v249_v3 }
  0x8a   :  { %83 = vst [vmem:[#allocation2] sm:$0xf] %v79_v13  ;;  %v45_v18 = vpop.permute.xlu0 %44  ;;  %v47_v19 = vpop.permute.xlu1 %46 }
  0x8b   :  { %v49_v20 = vsel %vm48_vm2, %v43_v11, %v45_v18  ;;  %v50_v22 = vsel %vm48_vm2, %v45_v18, %v47_v19  ;;  %v51_v23 = vsel %vm48_vm2, %v47_v19, %v38_v8 }
  0x8c   :  { %v80_v24 = vmul.f32 %v66_v14, %v49_v20  ;;  %v81_v25 = vmul.f32 %v70_v15, %v50_v22  ;;  %v82_v26 = vmul.f32 %v74_v16, %v51_v23 }
  0x8e   :  { %84 = vst [vmem:[#allocation2 + $0x8] sm:$0xf] %v80_v24  ;;  %85 = vst [vmem:[#allocation2 + $0x10] sm:$0xf] %v81_v25  ;;  %v149_v28 = vpop.permute.xlu0 %148  ;;  %v152_v29 = vpop.permute.xlu1 %151  ;;  %v431_v25 = vrot.slane %v1393_v52, %v1864_v7 }
  0x8f   :  { %86 = vst [vmem:[#allocation2 + $0x18] sm:$0xf] %v82_v26  ;;  %v165_v30 = vsel %vm157_vm3, %v149_v28, %v152_v29  ;;  %v435_v26 = vrot.slane %v1393_v52, %v1870_v9 }
  0x90   :  { %v189_v31 = vmul.f32 %v172_v27, %v165_v30  ;;  %v439_v27 = vrot.slane %v1393_v52, %v1873_v10 }
  0x91   :  { %v514_v17 = vld [vmem:[#allocation2] sm:$0xff] }
  0x92   :  { %193 = vst [vmem:[#allocation2 + $0x20] sm:$0xf] %v189_v31  ;;  %v154_v36 = vpop.permute.xlu0 %153  ;;  %v156_v37 = vpop.permute.xlu1 %155 }
  0x93   :  { %v158_v38 = vsel %vm157_vm3, %v152_v29, %v154_v36  ;;  %v159_v39 = vsel %vm157_vm3, %v154_v36, %v156_v37  ;;  %v160_v40 = vsel %vm157_vm3, %v156_v37, %v149_v28  ;;  %v1392_v28 = vld [vmem:[%s2395_s3 + $0x6] ss:$8 sm:$0xf] }
  0x94   :  { %v190_v41 = vmul.f32 %v176_v32, %v158_v38  ;;  %v191_v42 = vmul.f32 %v180_v33, %v159_v39  ;;  %v192_v43 = vmul.f32 %v184_v34, %v160_v40  ;;  %v378_v38 = vrot.slane %v1392_v28, %v1861_v6 }
  0x95   :  { %v515_v63 = vld [vmem:[#allocation2 + $0x8] sm:$0xff]  ;;  %v516_v18 = vld [vmem:[#allocation2 + $0x10] sm:$0xff] }
  0x96   :  { %194 = vst [vmem:[#allocation2 + $0x28] sm:$0xf] %v190_v41  ;;  %195 = vst [vmem:[#allocation2 + $0x30] sm:$0xf] %v191_v42  ;;  %v294_v45 = vpop.permute.xlu0 %293  ;;  %v296_v46 = vpop.permute.xlu1 %295  ;;  %v517_v16 = vld [vmem:[#allocation2 + $0x18] sm:$0xff] }
  0x97   :  { %196 = vst [vmem:[#allocation2 + $0x38] sm:$0xf] %v192_v43  ;;  %v302_v47 = vsel %vm301_vm4, %v294_v45, %v296_v46 }
  0x98   :  { %v334_v48 = vmul.f32 %v317_v44, %v302_v47  ;;  %v386_v47 = vrot.slane %v1392_v28, %v1870_v9 }
  0x99   :  { %v518_v0 = vld [vmem:[#allocation2 + $0x20] sm:$0xff] }
  0x9a   :  { %v342_v53 = vrot.slane %v334_v48, 4  ;;  %v298_v54 = vpop.permute.xlu0 %297  ;;  %v300_v55 = vpop.permute.xlu1 %299  ;;  %v1563_v22 = vpack.c.bf16 %v518_v0, %v514_v17  ;;  %v390_v48 = vrot.slane %v1392_v28, %v1873_v10 }
  0x9b   :  { %v303_v56 = vsel %vm301_vm4, %v296_v46, %v298_v54  ;;  %v304_v57 = vsel %vm301_vm4, %v298_v54, %v300_v55  ;;  %v310_v58 = vsel %vm301_vm4, %v300_v55, %v294_v45  ;;  %v382_v46 = vrot.slane %v1392_v28, %v1864_v7 }
  0x9c   :  { %350 = vst [vmem:[#allocation2 + $0x40] sm:$0xf0] %v342_v53  ;;  %v335_v59 = vmul.f32 %v321_v49, %v303_v56  ;;  %v336_v60 = vmul.f32 %v325_v50, %v304_v57  ;;  %v337_v61 = vmul.f32 %v329_v51, %v310_v58  ;;  %v1394_v49 = vld [vmem:[%s2395_s3 + $0x20] ss:$8 sm:$0xf] }
  0x9d   :  { %v519_v1 = vld [vmem:[#allocation2 + $0x28] sm:$0xff]  ;;  %v520_v3 = vld [vmem:[#allocation2 + $0x30] sm:$0xff]  ;;  %v488_v58 = vrot.slane %v1394_v49, %v1861_v6  ;;  %v496_v0 = vrot.slane %v1394_v49, %v1870_v9 }
  0x9e   :  { %v521_v2 = vld [vmem:[#allocation2 + $0x38] sm:$0xff]  ;;  %v343_v8 = vrot.slane %v335_v59, 4  ;;  %v344_v11 = vrot.slane %v336_v60, 4  ;;  %v345_v12 = vrot.slane %v337_v61, 4  ;;  %v404_v13 = vpop.permute.xlu0 %403  ;;  %v406_v14 = vpop.permute.xlu1 %405  ;;  %v1561_v15 = vpack.c.bf16 %v519_v1, %v515_v63 }
  0x9f   :  { %v412_v19 = vsel %vm411_vm5, %v404_v13, %v406_v14  ;;  %v1569_v20 = vpack.c.bf16 %v521_v2, %v517_v16  ;;  %v1571_v23 = vpack.c.bf16 %v520_v3, %v516_v18  ;;  %v492_v63 = vrot.slane %v1394_v49, %v1864_v7 }
  0xa0   :  { %351 = vst [vmem:[#allocation2 + $0x48] sm:$0xf0] %v343_v8  ;;  %352 = vst [vmem:[#allocation2 + $0x50] sm:$0xf0] %v344_v11  ;;  %v444_v24 = vmul.f32 %v427_v62, %v412_v19  ;;  %1562 = vmatprep.subr.bf16.mxu0 %v1561_v15  ;;  %v500_v1 = vrot.slane %v1394_v49, %v1873_v10  ;;  %v771_v49 = vld [vmem:[%s2396_s4 + $0x90] sm:$0xff] }
  0xa1   :  { %353 = vst [vmem:[#allocation2 + $0x58] sm:$0xf0] %v345_v12  ;;  %1570 = vmatprep.subr.bf16.mxu1 %v1569_v20  ;;  %1564 = vmatpush1.bf16.msra.mxu0 %v1563_v22 }
  0xa2   :  { %v452_v29 = vrot.slane %v444_v24, 4  ;;  %1572 = vmatpush1.bf16.msra.mxu1 %v1571_v23  ;;  %v408_v30 = vpop.permute.xlu0 %407  ;;  %v410_v31 = vpop.permute.xlu1 %409 }
  0xa3   :  { %v413_v32 = vsel %vm411_vm5, %v406_v14, %v408_v30  ;;  %v414_v33 = vsel %vm411_vm5, %v408_v30, %v410_v31  ;;  %v420_v34 = vsel %vm411_vm5, %v410_v31, %v404_v13  ;;  %v522_v22 = vld [vmem:[#allocation2 + $0x40] sm:$0xff] }
  0xa4   :  { %460 = vst [vmem:[#allocation2 + $0x60] sm:$0xf0] %v452_v29  ;;  %v445_v35 = vmul.f32 %v431_v25, %v413_v32  ;;  %v446_v36 = vmul.f32 %v435_v26, %v414_v33  ;;  %v447_v37 = vmul.f32 %v439_v27, %v420_v34  ;;  %v513_v25 = vld [vmem:[%s2393_s1] sm:$0xff] }
  0xa6   :  { %v453_v39 = vrot.slane %v445_v35, 4  ;;  %v454_v40 = vrot.slane %v446_v36, 4  ;;  %v455_v41 = vrot.slane %v447_v37, 4  ;;  %v355_v42 = vpop.permute.xlu0 %354  ;;  %v357_v43 = vpop.permute.xlu1 %356 }
  0xa7   :  { %v363_v44 = vsel %vm362_vm6, %v355_v42, %v357_v43  ;;  %v523_v12 = vld [vmem:[#allocation2 + $0x48] sm:$0xff]  ;;  %v524_v7 = vld [vmem:[#allocation2 + $0x50] sm:$0xff] }
  0xa8   :  { %461 = vst [vmem:[#allocation2 + $0x68] sm:$0xf0] %v453_v39  ;;  %462 = vst [vmem:[#allocation2 + $0x70] sm:$0xf0] %v454_v40  ;;  %v395_v45 = vmul.f32 %v378_v38, %v363_v44  ;;  %v525_v16 = vld [vmem:[#allocation2 + $0x58] sm:$0xff]  ;;  %v769_v44 = vld [vmem:[%s2396_s4 + $0x80] sm:$0xff] }
  0xa9   :  { %463 = vst [vmem:[#allocation2 + $0x78] sm:$0xf0] %v455_v41 }
  0xaa   :  { %399 = vst [vmem:[#allocation2 + $0x60] sm:$0xf] %v395_v45  ;;  %v359_v50 = vpop.permute.xlu0 %358  ;;  %v361_v51 = vpop.permute.xlu1 %360  ;;  %v770_v45 = vld [vmem:[%s2396_s4 + $0x88] sm:$0xff] }
  0xab   :  { %v364_v52 = vsel %vm362_vm6, %v357_v43, %v359_v50  ;;  %v365_v53 = vsel %vm362_vm6, %v359_v50, %v361_v51  ;;  %v371_v54 = vsel %vm362_vm6, %v361_v51, %v355_v42  ;;  %v772_v50 = vld [vmem:[%s2396_s4 + $0x98] sm:$0xff] }
  0xac   :  { %v396_v55 = vmul.f32 %v382_v46, %v364_v52  ;;  %v397_v56 = vmul.f32 %v386_v47, %v365_v53  ;;  %v398_v57 = vmul.f32 %v390_v48, %v371_v54  ;;  %v753_v46 = vld [vmem:[%s2396_s4] sm:$0xff]  ;;  %v1577_v47 = vpack.c.bf16 %v770_v45, %v769_v44  ;;  %v754_v48 = vld [vmem:[%s2396_s4 + $0x8] sm:$0xff]  ;;  %v755_v53 = vld [vmem:[%s2396_s4 + $0x10] sm:$0xff] }
  0xad   :  { %v1579_v51 = vpack.c.bf16 %v754_v48, %v753_v46  ;;  %v1581_v52 = vpack.c.bf16 %v772_v50, %v771_v49  ;;  %v756_v54 = vld [vmem:[%s2396_s4 + $0x18] sm:$0xff] }
  0xae   :  { %400 = vst [vmem:[#allocation2 + $0x68] sm:$0xf] %v396_v55  ;;  %401 = vst [vmem:[#allocation2 + $0x70] sm:$0xf] %v397_v56  ;;  %v465_v59 = vpop.permute.xlu0 %464  ;;  %v467_v60 = vpop.permute.xlu1 %466  ;;  %v773_v55 = vld [vmem:[%s2396_s4 + $0xa0] sm:$0xff]  ;;  %v774_v56 = vld [vmem:[%s2396_s4 + $0xa8] sm:$0xff] }
  0xaf   :  { %402 = vst [vmem:[#allocation2 + $0x78] sm:$0xf] %v398_v57  ;;  %v473_v61 = vsel %vm472_vm7, %v465_v59, %v467_v60 }
  0xb0   :  { %v505_v62 = vmul.f32 %v488_v58, %v473_v61  ;;  %v1583_v58 = vpack.c.bf16 %v756_v54, %v755_v53  ;;  %v758_v61 = vld [vmem:[%s2396_s4 + $0x28] sm:$0xff] }
  0xb1   :  { %v526_v17 = vld [vmem:[#allocation2 + $0x60] sm:$0xff] }
  0xb2   :  { %509 = vst [vmem:[#allocation2 + $0x80] sm:$0xf] %v505_v62  ;;  %v469_v2 = vpop.permute.xlu0 %468  ;;  %v471_v3 = vpop.permute.xlu1 %470  ;;  %v1567_v24 = vpack.c.bf16 %v526_v17, %v522_v22  ;;  %v775_v62 = vld [vmem:[%s2396_s4 + $0xb0] sm:$0xff] }
  0xb3   :  { %v474_v8 = vsel %vm472_vm7, %v467_v60, %v469_v2  ;;  %v475_v6 = vsel %vm472_vm7, %v469_v2, %v471_v3  ;;  %v481_v11 = vsel %vm472_vm7, %v471_v3, %v465_v59  ;;  %v1585_v59 = vpack.c.bf16 %v774_v56, %v773_v55  ;;  %v757_v60 = vld [vmem:[%s2396_s4 + $0x20] sm:$0xff]  ;;  %v759_v2 = vld [vmem:[%s2396_s4 + $0x30] sm:$0xff]  ;;  %v760_v3 = vld [vmem:[%s2396_s4 + $0x38] sm:$0xff] }
  0xb4   :  { %v506_v13 = vmul.f32 %v492_v63, %v474_v8  ;;  %v507_v14 = vmul.f32 %v496_v0, %v475_v6  ;;  %v508_v15 = vmul.f32 %v500_v1, %v481_v11  ;;  %v776_v63 = vld [vmem:[%s2396_s4 + $0xb8] sm:$0xff]  ;;  %v1587_v0 = vpack.c.bf16 %v758_v61, %v757_v60  ;;  %v777_v8 = vld [vmem:[%s2396_s4 + $0xc0] sm:$0xff]  ;;  %v778_v6 = vld [vmem:[%s2396_s4 + $0xc8] sm:$0xff] }
  0xb5   :  { %v527_v18 = vld [vmem:[#allocation2 + $0x68] sm:$0xff]  ;;  %v528_v19 = vld [vmem:[#allocation2 + $0x70] sm:$0xff]  ;;  %v1589_v1 = vpack.c.bf16 %v776_v63, %v775_v62  ;;  %v1591_v11 = vpack.c.bf16 %v760_v3, %v759_v2  ;;  %v1062_v62 = vld [vmem:[%s2397_s5 + $0x80] sm:$0xff] }
  0xb6   :  { %v529_v9 = vld [vmem:[#allocation2 + $0x78] sm:$0xff]  ;;  %510 = vst [vmem:[#allocation2 + $0x88] sm:$0xf] %v506_v13  ;;  %511 = vst [vmem:[#allocation2 + $0x90] sm:$0xf] %v507_v14  ;;  %v1565_v10 = vpack.c.bf16 %v527_v18, %v523_v12  ;;  %v1575_v23 = vpack.c.bf16 %v528_v19, %v524_v7  ;;  %v1593_v12 = vpack.c.bf16 %v778_v6, %v777_v8  ;;  %v761_v13 = vld [vmem:[%s2396_s4 + $0x40] sm:$0xff] }
  0xb7   :  { %512 = vst [vmem:[#allocation2 + $0x98] sm:$0xf] %v508_v15  ;;  %v1573_v20 = vpack.c.bf16 %v529_v9, %v525_v16  ;;  %v762_v14 = vld [vmem:[%s2396_s4 + $0x48] sm:$0xff]  ;;  %v779_v15 = vld [vmem:[%s2396_s4 + $0xd0] sm:$0xff]  ;;  %v780_v16 = vld [vmem:[%s2396_s4 + $0xd8] sm:$0xff] }
  0xb8   :  { %1566 = vmatprep.subr.bf16.mxu0 %v1565_v10  ;;  %v1595_v17 = vpack.c.bf16 %v762_v14, %v761_v13  ;;  %v1597_v7 = vpack.c.bf16 %v780_v16, %v779_v15  ;;  %v763_v18 = vld [vmem:[%s2396_s4 + $0x50] sm:$0xff]  ;;  %v764_v9 = vld [vmem:[%s2396_s4 + $0x58] sm:$0xff]  ;;  %v781_v19 = vld [vmem:[%s2396_s4 + $0xe0] sm:$0xff] }
  0xb9   :  { %1574 = vmatprep.subr.bf16.mxu1 %v1573_v20  ;;  %1568 = vmatpush1.bf16.msra.mxu0 %v1567_v24  ;;  %v530_v29 = vld [vmem:[#allocation2 + $0x80] sm:$0xf]  ;;  %v782_v10 = vld [vmem:[%s2396_s4 + $0xe8] sm:$0xff]  ;;  %v1599_v20 = vpack.c.bf16 %v764_v9, %v763_v18  ;;  %v1064_v15 = vld [vmem:[%s2397_s5 + $0x90] sm:$0xff] }
  0xba   :  { %1576 = vmatpush1.bf16.msra.mxu1 %v1575_v23  ;;  %v1601_v22 = vpack.c.bf16 %v782_v10, %v781_v19  ;;  %v765_v23 = vld [vmem:[%s2396_s4 + $0x60] sm:$0xff]  ;;  %v766_v24 = vld [vmem:[%s2396_s4 + $0x68] sm:$0xff]  ;;  %v1065_v16 = vld [vmem:[%s2397_s5 + $0x98] sm:$0xff] }
  0xbb   :  { %v1063_v63 = vld [vmem:[%s2397_s5 + $0x88] sm:$0xff]  ;;  %v1094_v8 = vld [vmem:[%s2397_s5 + $0x180] sm:$0xff]  ;;  %v1049_v18 = vld [vmem:[%s2397_s5 + $0x18] sm:$0xff] }
  0xbc   :  { %v1047_v2 = vld [vmem:[%s2397_s5 + $0x8] sm:$0xff] }
  0xbd   :  { %v531_v26 = vld [vmem:[#allocation2 + $0x88] sm:$0xf]  ;;  %v532_v28 = vld [vmem:[#allocation2 + $0x90] sm:$0xf] }
  0xbe   :  { %v533_v27 = vld [vmem:[#allocation2 + $0x98] sm:$0xf]  ;;  %1395 = vmatprep.subr.msk.mxu0 %vm544_vm8, %v531_v26  ;;  %v783_v26 = vld [vmem:[%s2396_s4 + $0xf0] sm:$0xff]  ;;  %v1095_v6 = vld [vmem:[%s2397_s5 + $0x188] sm:$0xff] }
  0xbf   :  { %1398 = vmatprep.subr.msk.mxu1 %vm544_vm8, %v533_v27  ;;  %1396 = vmatpush1.msk.msra.mxu0 %vm544_vm8, %v530_v29  ;;  %v784_v27 = vld [vmem:[%s2396_s4 + $0xf8] sm:$0xff]  ;;  %v1079_v13 = vld [vmem:[%s2397_s5 + $0x108] sm:$0xff] }
  0xc0   :  { %1399 = vmatpush1.msk.msra.mxu1 %vm544_vm8, %v532_v28  ;;  %1397 = vmatmul.mubr.msk.f32.vlgmr.msra.gmra.mrb[0].mxu0 %vm540_vm9, %v513_v25  ;;  %v1605_v29 = vpack.c.bf16 %v784_v27, %v783_v26  ;;  %v1080_v26 = vld [vmem:[%s2397_s5 + $0x110] sm:$0xff]  ;;  %v1081_v27 = vld [vmem:[%s2397_s5 + $0x118] sm:$0xff] }
  0xc1   :  { %1400 = vmatmul.mubr.msk.f32.vlgmr.msra.gmra.mrb[0].mxu1 %vm540_vm9, %v513_v25  ;;  %1578 = vmatprep.subr.bf16.mxu0 %v1577_v47  ;;  %v1603_v25 = vpack.c.bf16 %v766_v24, %v765_v23 }
  0xc2   :  { %1610 = vmatprep.subr.bf16.mxu1 %v1577_v47  ;;  %1580 = vmatpush3.bf16.msra.mxu0 %v1579_v51 }
  0xc3   :  { %v538_v30 = vpop.permute.xlu0 %537  ;;  %1612 = vmatpush3.bf16.msra.mxu1 %v1579_v51  ;;  %1582 = vmatprep.subr.bf16.mxu0 %v1581_v52 }
  0xc4   :  { %1614 = vmatprep.subr.bf16.mxu1 %v1581_v52 }
  0xc6   :  { %1584 = vmatpush3.bf16.msra.mxu0 %v1583_v58 }
  0xc7   :  { %1616 = vmatpush3.bf16.msra.mxu1 %v1583_v58  ;;  %1586 = vmatprep.subr.bf16.mxu0 %v1585_v59 }
  0xc8   :  { %1618 = vmatprep.subr.bf16.mxu1 %v1585_v59 }
  0xca   :  { %1588 = vmatpush3.bf16.msra.mxu0 %v1587_v0 }
  0xcb   :  { %1620 = vmatpush3.bf16.msra.mxu1 %v1587_v0  ;;  %1590 = vmatprep.subr.bf16.mxu0 %v1589_v1  ;;  %v1641_v0 = vpack.c.bf16 %v1063_v63, %v1062_v62 }
  0xcc   :  { %1622 = vmatprep.subr.bf16.mxu1 %v1589_v1  ;;  %v1046_v1 = vld [vmem:[%s2397_s5] sm:$0xff] }
  0xcd   :  { %v1643_v3 = vpack.c.bf16 %v1047_v2, %v1046_v1  ;;  %v1055_v1 = vld [vmem:[%s2397_s5 + $0x48] sm:$0xff] }
  0xce   :  { %1592 = vmatpush3.bf16.msra.mxu0 %v1591_v11 }
  0xcf   :  { %1624 = vmatpush3.bf16.msra.mxu1 %v1591_v11  ;;  %1594 = vmatprep.subr.bf16.mxu0 %v1593_v12  ;;  %v1673_v11 = vpack.c.bf16 %v1095_v6, %v1094_v8  ;;  %v1103_v8 = vld [vmem:[%s2397_s5 + $0x1c8] sm:$0xff] }
  0xd0   :  { %1626 = vmatprep.subr.bf16.mxu1 %v1593_v12  ;;  %v1078_v12 = vld [vmem:[%s2397_s5 + $0x100] sm:$0xff] }
  0xd1   :  { %v1675_v14 = vpack.c.bf16 %v1079_v13, %v1078_v12  ;;  %v1087_v12 = vld [vmem:[%s2397_s5 + $0x148] sm:$0xff] }
  0xd2   :  { %1596 = vmatpush3.bf16.msra.mxu0 %v1595_v17 }
  0xd3   :  { %1628 = vmatpush3.bf16.msra.mxu1 %v1595_v17  ;;  %1598 = vmatprep.subr.bf16.mxu0 %v1597_v7  ;;  %v1645_v17 = vpack.c.bf16 %v1065_v16, %v1064_v15  ;;  %v1073_v15 = vld [vmem:[%s2397_s5 + $0xd8] sm:$0xff]  ;;  %v1056_v16 = vld [vmem:[%s2397_s5 + $0x50] sm:$0xff] }
  0xd4   :  { %1630 = vmatprep.subr.bf16.mxu1 %v1597_v7  ;;  %v1048_v7 = vld [vmem:[%s2397_s5 + $0x10] sm:$0xff] }
  0xd5   :  { %v1647_v10 = vpack.c.bf16 %v1049_v18, %v1048_v7 }
  0xd6   :  { %1600 = vmatpush3.bf16.msra.mxu0 %v1599_v20 }
  0xd7   :  { %1632 = vmatpush3.bf16.msra.mxu1 %v1599_v20  ;;  %1602 = vmatprep.subr.bf16.mxu0 %v1601_v22  ;;  %v1096_v20 = vld [vmem:[%s2397_s5 + $0x190] sm:$0xff] }
  0xd8   :  { %1634 = vmatprep.subr.bf16.mxu1 %v1601_v22  ;;  %v1097_v22 = vld [vmem:[%s2397_s5 + $0x198] sm:$0xff] }
  0xda   :  { %1604 = vmatpush3.bf16.msra.mxu0 %v1603_v25 }
  0xdb   :  { %1636 = vmatpush3.bf16.msra.mxu1 %v1603_v25  ;;  %1606 = vmatprep.subr.bf16.mxu0 %v1605_v29  ;;  %v1677_v25 = vpack.c.bf16 %v1097_v22, %v1096_v20 }
  0xdc   :  { %1638 = vmatprep.subr.bf16.mxu1 %v1605_v29 }
 0x193   :  { %v623_v31 = vpop.f32.mrb[0].mxu0 }
 0x194   :  { %v694_v32 = vpop.f32.mrb[0].mxu1  ;;  %v1986_v33 = vadd.f32 %v623_v31, %v538_v30  ;;  %v625_v34 = vpop.f32.mrb[1].mxu0  ;;  %v768_v31 = vld [vmem:[%s2396_s4 + $0x78] sm:$0xff] }
 0x195   :  { %v696_v35 = vpop.f32.mrb[1].mxu1  ;;  %v1988_v36 = vadd.f32 %v694_v32, %v538_v30  ;;  %v1990_v37 = vadd.f32 %v625_v34, %v538_v30 }
 0x196   :  { %v1992_v38 = vadd.f32 %v696_v35, %v538_v30  ;;  %v699_v39 = vmax.f32 %v1986_v33, 0.0  ;;  %v767_v30 = vld [vmem:[%s2396_s4 + $0x70] sm:$0xff] }
 0x197   :  { %v700_v40 = vmax.f32 %v1990_v37, 0.0  ;;  %v701_v41 = vmax.f32 %v1988_v36, 0.0  ;;  %v1607_v35 = vpack.c.bf16 %v768_v31, %v767_v30  ;;  %v1679_v30 = vpack.c.bf16 %v1081_v27, %v1080_v26  ;;  %v1066_v31 = vld [vmem:[%s2397_s5 + $0xa0] sm:$0xff]  ;;  %v1075_v26 = vld [vmem:[%s2397_s5 + $0xe8] sm:$0xff] }
 0x198   :  { %v702_v43 = vmax.f32 %v1992_v38, 0.0  ;;  %v1058_v27 = vld [vmem:[%s2397_s5 + $0x60] sm:$0xff] }
 0x199   :  { %v1728_v42 = vpack.i.bf16 %v700_v40, %v699_v39  ;;  %1608 = vmatpush3.bf16.msra.mxu0 %v1607_v35  ;;  %1640 = vmatpush3.bf16.msra.mxu1 %v1607_v35 }
 0x19a   :  { %v1733_v57 = vpack.i.bf16 %v702_v43, %v701_v41  ;;  %1642 = vmatprep.subr.bf16.mxu0 %v1641_v0  ;;  %1674 = vmatprep.subr.bf16.mxu1 %v1673_v11  ;;  %v1054_v0 = vld [vmem:[%s2397_s5 + $0x40] sm:$0xff] }
 0x19b   :  { %1729 = vrot.lane.b32.xlu1 %v1728_v42, %s1783_s18  ;;  %v1659_v2 = vpack.c.bf16 %v1055_v1, %v1054_v0  ;;  %v1086_v11 = vld [vmem:[%s2397_s5 + $0x140] sm:$0xff] }
 0x19c   :  { %v1691_v13 = vpack.c.bf16 %v1087_v12, %v1086_v11 }
 0x19f   :  { %1734 = vrot.lane.b32.xlu1 %v1733_v57, %s1783_s18 }
 0x20d   :  { %v1730_v28 = vpop.permute.xlu1 %1729 }
 0x20e   :  { %v1732_v32 = vunpack.i.h.bf16 %v1730_v28  ;;  %v1731_v34 = vunpack.i.l.bf16 %v1730_v28 }
 0x210   :  { %v715_v44 = vsel %vm301_vm4, %v1731_v34, %v1732_v32 }
 0x211   :  { %v1735_v42 = vpop.permute.xlu1 %1734  ;;  %v724_v52 = vmax.f32 %v699_v39, %v715_v44  ;;  %v1050_v44 = vld [vmem:[%s2397_s5 + $0x20] sm:$0xff] }
 0x212   :  { %v1737_v45 = vunpack.i.h.bf16 %v1735_v42  ;;  %v1736_v46 = vunpack.i.l.bf16 %v1735_v42 }
 0x214   :  { %v716_v47 = vsel %vm301_vm4, %v1732_v32, %v1736_v46  ;;  %v717_v48 = vsel %vm301_vm4, %v1736_v46, %v1737_v45  ;;  %v723_v49 = vsel %vm301_vm4, %v1737_v45, %v1731_v34  ;;  %v1067_v32 = vld [vmem:[%s2397_s5 + $0xa8] sm:$0xff]  ;;  %v1098_v46 = vld [vmem:[%s2397_s5 + $0x1a0] sm:$0xff] }
 0x215   :  { %v726_v50 = vmax.f32 %v701_v41, %v717_v48  ;;  %v727_v51 = vmax.f32 %v702_v43, %v723_v49  ;;  %v725_v53 = vmax.f32 %v700_v40, %v716_v47  ;;  %v1649_v34 = vpack.c.bf16 %v1067_v32, %v1066_v31  ;;  %v1051_v45 = vld [vmem:[%s2397_s5 + $0x28] sm:$0xff]  ;;  %v1082_v48 = vld [vmem:[%s2397_s5 + $0x120] sm:$0xff] }
 0x216   :  { %v1099_v47 = vld [vmem:[%s2397_s5 + $0x1a8] sm:$0xff] }
 0x217   :  { %v1743_v54 = vpack.i.bf16 %v727_v51, %v726_v50  ;;  %v1738_v55 = vpack.i.bf16 %v725_v53, %v724_v52  ;;  %v1083_v49 = vld [vmem:[%s2397_s5 + $0x128] sm:$0xff] }
 0x218   :  { %v1059_v32 = vld [vmem:[%s2397_s5 + $0x68] sm:$0xff] }
 0x219   :  { %1744 = vrot.lane.b32.xlu1 %v1743_v54, %s1784_s19  ;;  %1739 = vrot.lane.b32.xlu0 %v1738_v55, %s1784_s19 }
 0x28b   :  { %v1745_v56 = vpop.permute.xlu1 %1744  ;;  %v1740_v57 = vpop.permute.xlu0 %1739 }
 0x28c   :  { %v1747_v58 = vunpack.i.h.bf16 %v1745_v56  ;;  %v1746_v36 = vunpack.i.l.bf16 %v1745_v56  ;;  %v1742_v41 = vunpack.i.h.bf16 %v1740_v57  ;;  %v1741_v59 = vunpack.i.l.bf16 %v1740_v57 }
 0x28d   :  { %v1683_v56 = vpack.c.bf16 %v1083_v49, %v1082_v48  ;;  %v1077_v48 = vld [vmem:[%s2397_s5 + $0xf8] sm:$0xff]  ;;  %v1060_v49 = vld [vmem:[%s2397_s5 + $0x70] sm:$0xff] }
 0x28e   :  { %v742_v38 = vsel %vm411_vm5, %v1746_v36, %v1747_v58  ;;  %v740_v33 = vsel %vm411_vm5, %v1741_v59, %v1742_v41  ;;  %v741_v39 = vsel %vm411_vm5, %v1742_v41, %v1746_v36  ;;  %v748_v37 = vsel %vm411_vm5, %v1747_v58, %v1741_v59  ;;  %v1052_v58 = vld [vmem:[%s2397_s5 + $0x30] sm:$0xff]  ;;  %v1053_v36 = vld [vmem:[%s2397_s5 + $0x38] sm:$0xff] }
 0x28f   :  { %v751_v40 = vmax.f32 %v726_v50, %v742_v38  ;;  %v749_v43 = vmax.f32 %v724_v52, %v740_v33  ;;  %v750_v60 = vmax.f32 %v725_v53, %v741_v39  ;;  %v752_v61 = vmax.f32 %v727_v51, %v748_v37  ;;  %v1068_v52 = vld [vmem:[%s2397_s5 + $0xb0] sm:$0xff]  ;;  %v1069_v53 = vld [vmem:[%s2397_s5 + $0xb8] sm:$0xff] }
 0x290   :  { %v1651_v50 = vpack.c.bf16 %v1051_v45, %v1050_v44  ;;  %v1681_v51 = vpack.c.bf16 %v1099_v47, %v1098_v46  ;;  %v1653_v57 = vpack.c.bf16 %v1069_v53, %v1068_v52  ;;  %v1655_v41 = vpack.c.bf16 %v1053_v36, %v1052_v58  ;;  %v1100_v59 = vld [vmem:[%s2397_s5 + $0x1b0] sm:$0xff]  ;;  %v1101_v38 = vld [vmem:[%s2397_s5 + $0x1b8] sm:$0xff]  ;;  %v1090_v44 = vld [vmem:[%s2397_s5 + $0x160] sm:$0xff] }
 0x291   :  { %849 = vmatprep.mubr.f32.mxu0 %v750_v60  ;;  %981 = vmatprep.mubr.f32.mxu1 %v752_v61  ;;  %v1685_v33 = vpack.c.bf16 %v1101_v38, %v1100_v59  ;;  %v1084_v39 = vld [vmem:[%s2397_s5 + $0x130] sm:$0xff]  ;;  %v1085_v37 = vld [vmem:[%s2397_s5 + $0x138] sm:$0xff]  ;;  %v1071_v60 = vld [vmem:[%s2397_s5 + $0xc8] sm:$0xff]  ;;  %v1667_v47 = vpack.c.bf16 %v1059_v32, %v1058_v27  ;;  %v1791_v27 = vmov 1983009808  }
 0x292   :  { %850 = vmatmul.mubr.f32.vlgmr.msra.gmra.mrb[2].mxu0 %v749_v43  ;;  %982 = vmatmul.mubr.f32.vlgmr.msra.gmra.mrb[2].mxu1 %v751_v40  ;;  %v1687_v40 = vpack.c.bf16 %v1085_v37, %v1084_v39  ;;  %v1070_v43 = vld [vmem:[%s2397_s5 + $0xc0] sm:$0xff]  ;;  %v1091_v45 = vld [vmem:[%s2397_s5 + $0x168] sm:$0xff]  ;;  %v1076_v46 = vld [vmem:[%s2397_s5 + $0xf0] sm:$0xff] }
 0x293   :  { %1644 = vmatpush3.bf16.msra.mxu0 %v1643_v3  ;;  %1676 = vmatpush3.bf16.msra.mxu1 %v1675_v14  ;;  %v1657_v63 = vpack.c.bf16 %v1071_v60, %v1070_v43  ;;  %v1102_v3 = vld [vmem:[%s2397_s5 + $0x1c0] sm:$0xff]  ;;  %v1072_v14 = vld [vmem:[%s2397_s5 + $0xd0] sm:$0xff]  ;;  %v1109_v53 = vld [vmem:[%s2397_s5 + $0x1f8] sm:$0xff] }
 0x294   :  { %1646 = vmatprep.subr.bf16.mxu0 %v1645_v17  ;;  %1678 = vmatprep.subr.bf16.mxu1 %v1677_v25  ;;  %v1689_v6 = vpack.c.bf16 %v1103_v8, %v1102_v3  ;;  %v1661_v18 = vpack.c.bf16 %v1073_v15, %v1072_v14  ;;  %v1074_v25 = vld [vmem:[%s2397_s5 + $0xe0] sm:$0xff]  ;;  %v1108_v52 = vld [vmem:[%s2397_s5 + $0x1f0] sm:$0xff]  ;;  %v1093_v58 = vld [vmem:[%s2397_s5 + $0x178] sm:$0xff] }
 0x295   :  { %v1665_v31 = vpack.c.bf16 %v1075_v26, %v1074_v25 }
 0x297   :  { %1648 = vmatpush3.bf16.msra.mxu0 %v1647_v10  ;;  %1680 = vmatpush3.bf16.msra.mxu1 %v1679_v30  ;;  %v1105_v10 = vld [vmem:[%s2397_s5 + $0x1d8] sm:$0xff] }
 0x298   :  { %1650 = vmatprep.subr.bf16.mxu0 %v1649_v34  ;;  %1682 = vmatprep.subr.bf16.mxu1 %v1681_v51  ;;  %v1106_v34 = vld [vmem:[%s2397_s5 + $0x1e0] sm:$0xff]  ;;  %v1061_v51 = vld [vmem:[%s2397_s5 + $0x78] sm:$0xff] }
 0x29b   :  { %1652 = vmatpush3.bf16.msra.mxu0 %v1651_v50  ;;  %1684 = vmatpush3.bf16.msra.mxu1 %v1683_v56  ;;  %v1669_v50 = vpack.c.bf16 %v1077_v48, %v1076_v46  ;;  %v1671_v56 = vpack.c.bf16 %v1061_v51, %v1060_v49  ;;  %v1281_v48 = vld [vmem:[%s2399_s7 + $0x8] sm:$0xff]  ;;  %v1283_v51 = vld [vmem:[%s2399_s7 + $0x18] sm:$0xff] }
 0x29c   :  { %1654 = vmatprep.subr.bf16.mxu0 %v1653_v57  ;;  %1686 = vmatprep.subr.bf16.mxu1 %v1685_v33  ;;  %v1092_v57 = vld [vmem:[%s2397_s5 + $0x170] sm:$0xff] }
 0x29d   :  { %v1703_v36 = vpack.c.bf16 %v1093_v58, %v1092_v57 }
 0x29f   :  { %1656 = vmatpush3.bf16.msra.mxu0 %v1655_v41  ;;  %1688 = vmatpush3.bf16.msra.mxu1 %v1687_v40  ;;  %v1790_v41 = vmov 1966171168  }
 0x2a0   :  { %1658 = vmatprep.subr.bf16.mxu0 %v1657_v63  ;;  %1690 = vmatprep.subr.bf16.mxu1 %v1689_v6  ;;  %v890_v59 = vunpack.c.l.s4 %v1790_v41 }
 0x2a2   :  { %v891_v39 = vunpack.c.0.s8 %v890_v59 }
 0x2a3   :  { %1660 = vmatpush3.bf16.msra.mxu0 %v1659_v2  ;;  %1692 = vmatpush3.bf16.msra.mxu1 %v1691_v13 }
 0x2a4   :  { %1662 = vmatprep.subr.bf16.mxu0 %v1661_v18 }
 0x365   :  { %v1437_v9 = vpop.f32.mrb[2].mxu0  ;;  %v1472_v19 = vpop.f32.mrb[2].mxu1 }
 0x366   :  { %v1438_v23 = vpop.f32.mrb[3].mxu0  ;;  %v1473_v24 = vpop.f32.mrb[3].mxu1 }
 0x367   :  { %v2170_v28 = vadd.f32 %v1438_v23, %v1437_v9  ;;  %v2172_v29 = vadd.f32 %v1473_v24, %v1472_v19  ;;  %v1057_v9 = vld [vmem:[%s2397_s5 + $0x58] sm:$0xff]  ;;  %v1104_v19 = vld [vmem:[%s2397_s5 + $0x1d0] sm:$0xff] }
 0x368   :  { %v1663_v20 = vpack.c.bf16 %v1057_v9, %v1056_v16  ;;  %v1693_v22 = vpack.c.bf16 %v1105_v10, %v1104_v19  ;;  %v1088_v23 = vld [vmem:[%s2397_s5 + $0x150] sm:$0xff]  ;;  %v1089_v24 = vld [vmem:[%s2397_s5 + $0x158] sm:$0xff] }
 0x369   :  { %v862_v35 = vrot.slane %v2170_v28, 3  ;;  %v856_v42 = vrot.slane %v2170_v28, 1  ;;  %v874_v54 = vrot.slane %v2170_v28, 7  ;;  %v868_v55 = vrot.slane %v2170_v28, 5 }
 0x36a   :  { %v994_v61 = vrot.slane %v2172_v29, 3  ;;  %v988_v62 = vrot.slane %v2172_v29, 1  ;;  %v1006_v17 = vrot.slane %v2172_v29, 7  ;;  %v1000_v7 = vrot.slane %v2172_v29, 5  ;;  %1694 = vmatprep.subr.bf16.mxu1 %v1693_v22  ;;  %1664 = vmatpush3.bf16.msra.mxu0 %v1663_v20 }
 0x36b   :  { %863 = vrot.lane.b32.xlu1 %v862_v35, %s1789_s27  ;;  %857 = vrot.lane.b32.xlu0 %v856_v42, %s1789_s27  ;;  %v1695_v30 = vpack.c.bf16 %v1089_v24, %v1088_v23  ;;  %v1107_v35 = vld [vmem:[%s2397_s5 + $0x1e8] sm:$0xff]  ;;  %v860_v38 = vrot.slane %v2170_v28, 2  ;;  %v872_v60 = vrot.slane %v2170_v28, 6  ;;  %v992_v6 = vrot.slane %v2172_v29, 2 }
 0x36c   :  { %v1697_v42 = vpack.c.bf16 %v1107_v35, %v1106_v34  ;;  %1666 = vmatprep.subr.bf16.mxu0 %v1665_v31  ;;  %v998_v18 = vrot.slane %v2172_v29, 4 }
 0x36d   :  { %1696 = vmatpush3.bf16.msra.mxu1 %v1695_v30  ;;  %v1120_v30 = vunpack.c.l.s4 %v1791_v27 }
 0x36e   :  { %1698 = vmatprep.subr.bf16.mxu1 %v1697_v42  ;;  %1668 = vmatpush3.bf16.msra.mxu0 %v1667_v47  ;;  %v1280_v47 = vld [vmem:[%s2399_s7] sm:$0xff] }
 0x36f   :  { %875 = vrot.lane.b32.xlu1 %v874_v54, %s1789_s27  ;;  %869 = vrot.lane.b32.xlu0 %v868_v55, %s1789_s27  ;;  %v1699_v54 = vpack.c.bf16 %v1091_v45, %v1090_v44  ;;  %v1701_v55 = vpack.c.bf16 %v1109_v53, %v1108_v52  ;;  %v1706_v49 = vpack.c.bf16 %v1281_v48, %v1280_v47 }
 0x370   :  { %1670 = vmatprep.subr.bf16.mxu0 %v1669_v50  ;;  %v1282_v50 = vld [vmem:[%s2399_s7 + $0x10] sm:$0xff] }
 0x371   :  { %1700 = vmatpush3.bf16.msra.mxu1 %v1699_v54  ;;  %v1709_v52 = vpack.c.bf16 %v1283_v51, %v1282_v50  ;;  %v1401_v54 = vld [vmem:[%s2398_s6] ss:$0 sm:$0xff]  ;;  %s1794_s6 = smov [#allocation4]  }
 0x372   :  { %1702 = vmatprep.subr.bf16.mxu1 %v1701_v55  ;;  %1672 = vmatpush3.bf16.msra.mxu0 %v1671_v56  ;;  %s1379_s20 = sshll.u32 %s1794_s6, 4  ;;  %s1380_s20 = int_to_ptr.vmem [resolvable:$true] %s1379_s20 }
 0x373   :  { %995 = vrot.lane.b32.xlu1 %v994_v61, %s1789_s27  ;;  %989 = vrot.lane.b32.xlu0 %v988_v62, %s1789_s27  ;;  %v866_v61 = vrot.slane %v2170_v28, 4  ;;  %v894_v62 = vsub.s32 %v891_v39, %v1858_v5  ;;  %s1755_s21 = scalar_lea.vmem %s1380_s20, 32  ;;  %p1760_p1 = scmp.lt.s32.totalorder %s1380_s20, %s1380_s20 }
 0x374   :  { %p1756_p0 = scmp.ne.s32.totalorder %s1380_s20, %s1755_s21  ;;  %p1761_p2 = scmp.lt.s32.totalorder %s1755_s21, %s1755_s21 }
 0x375   :  { %1704 = vmatpush3.bf16.msra.mxu1 %v1703_v36 }
 0x376   :  { %p1762_p3 = por %p1761_p2, %p1760_p1 }
 0x377   :  { %1007 = vrot.lane.b32.xlu1 %v1006_v17, %s1789_s27  ;;  %1001 = vrot.lane.b32.xlu0 %v1000_v7, %s1789_s27  ;;  %v1004_v7 = vrot.slane %v2172_v29, 6 }
 0x378   :  { %p1763_p4 = pnand %p1762_p3, %p1756_p0 }
 0x3dd   :  { %v864_v33 = vpop.permute.xlu1 %863  ;;  %v858_v37 = vpop.permute.xlu0 %857 }
 0x3de   :  { %v880_v40 = vsel %vm878_vm10, %v860_v38, %v864_v33  ;;  %v879_v43 = vsel %vm878_vm10, %v2170_v28, %v858_v37 }
 0x3df   :  { %v887_v63 = vcombine.low %v879_v43, %v880_v40 }
 0x3e1   :  { %v876_v0 = vpop.permute.xlu1 %875  ;;  %v870_v1 = vpop.permute.xlu0 %869  ;;  %v895_v11 = vrot.slane %v887_v63, %v894_v62 }
 0x3e2   :  { %v882_v2 = vsel %vm878_vm10, %v872_v60, %v876_v0  ;;  %v881_v3 = vsel %vm878_vm10, %v866_v61, %v870_v1 }
 0x3e3   :  { %v888_v8 = vcombine.low %v881_v3, %v882_v2 }
 0x3e5   :  { %v902_v12 = vrot.slane %v888_v8, %v894_v62  ;;  %v996_v13 = vpop.permute.xlu1 %995  ;;  %v990_v14 = vpop.permute.xlu0 %989 }
 0x3e6   :  { %v1011_v15 = vsel %vm878_vm10, %v992_v6, %v996_v13  ;;  %v1010_v28 = vsel %vm878_vm10, %v2172_v29, %v990_v14  ;;  %v1121_v29 = vunpack.c.0.s8 %v1120_v30 }
 0x3e7   :  { %v903_v16 = vcombine.low %v895_v11, %v902_v12  ;;  %v1018_v19 = vcombine.low %v1010_v28, %v1011_v15 }
 0x3e8   :  { %v1124_v32 = vsub.s32 %v1121_v29, %v1858_v5  ;;  %v1792_v5 = vmov 0.0|0.0  }
 0x3e9   :  { %v910_v9 = vrot.slane %v903_v16, %v894_v62  ;;  %v1008_v10 = vpop.permute.xlu1 %1007  ;;  %v1002_v20 = vpop.permute.xlu0 %1001  ;;  %v1026_v4 = vrot.slane %v1018_v19, %v894_v62  ;;  %1705 = vmatprep.subr.bf16.mxu0 %v1792_v5 }
 0x3ea   :  { %v1013_v22 = vsel %vm878_vm10, %v1004_v7, %v1008_v10  ;;  %v1012_v23 = vsel %vm878_vm10, %v998_v18, %v1002_v20 }
 0x3eb   :  { %916 = vst.msk [vmem:[#allocation3] ss:$2 sm:$0xf] %vm2348_vm11, %v910_v9  ;;  %v1019_v24 = vcombine.low %v1012_v23, %v1013_v22 }
 0x3ed   :  { %v1033_v25 = vrot.slane %v1019_v24, %v894_v62 }
 0x3ef   :  { %v1034_v26 = vcombine.low %v1026_v4, %v1033_v25 }
 0x3f1   :  { %v1041_v31 = vrot.slane %v1034_v26, %v894_v62 }
 0x3f3   :  { %1044 = vst.msk [vmem:[#allocation3 + $0x1] ss:$2 sm:$0xf] %vm2348_vm11, %v1041_v31 }
 0x3fa   :  { %v1045_v34 = vld [vmem:[#allocation3] sm:$0xff] }
 0x3fb   :  { %v1125_v35 = vrot.slane %v1045_v34, %v1124_v32  ;;  %v1118_v42 = vcombine.high %v1045_v34, %v1045_v34 }
 0x3fd   :  { %v1133_v44 = vcombine.high %v1125_v35, %v1125_v35  ;;  %v1132_v45 = vrot.slane %v1118_v42, %v1124_v32 }
 0x3ff   :  { %1203 = vmatprep.mubr.f32.mxu0 %v1133_v44  ;;  %v1134_v46 = vcombine.high %v1132_v45, %v1132_v45 }
 0x400   :  { %1204 = vmatmul.mubr.f32.vlgmr.msra.gmra.mrb[4].mxu0 %v1125_v35 }
 0x401   :  { %1273 = vmatprep.mubr.f32.mxu1 %v1134_v46  ;;  %1707 = vmatpush3.bf16.msra.mxu0 %v1706_v49 }
 0x402   :  { %1274 = vmatmul.mubr.f32.vlgmr.msra.gmra.mrb[4].mxu1 %v1132_v45  ;;  %1708 = vmatprep.subr.bf16.mxu0 %v1792_v5 }
 0x403   :  { %1558 = vmatprep.mubr.msk.f32.mxu0 %vm1793_vm12, %v1787_v21  ;;  %v1402_v21 = vld [vmem:[%s2400_s8] ss:$0 sm:$0xff] }
 0x405   :  { %1710 = vmatpush3.bf16.msra.mxu0 %v1709_v52 }
 0x4d3   :  { %v1507_v53 = vpop.f32.mrb[4].mxu0 }
 0x4d4   :  { %v1508_v55 = vpop.f32.mrb[5].mxu0 }
 0x4d5   :  { %v1509_v56 = vadd.f32 %v1508_v55, %v1507_v53  ;;  %v1542_v57 = vpop.f32.mrb[4].mxu1 }
 0x4d6   :  { %v1543_v58 = vpop.f32.mrb[5].mxu1 }
 0x4d7   :  { %v1206_v36 = vadd.f32 %v1509_v56, %v1401_v54  ;;  %v1544_v41 = vadd.f32 %v1543_v58, %v1542_v57 }
 0x4d9   :  { %v1276_v59 = vadd.f32 %v1544_v41, %v1206_v36 }
 0x4db   :  { %v1279_v38 = vmax.f32 %v1276_v59, 0.0 }
 0x4dd   :  { %1559 = vmatmul.mubr.msk.f32.vlgmr.msra.gmra.mrb[6].mxu0 %vm1291_vm13, %v1279_v38 }
 0x5b0   :  { %v1361_v33 = vpop.f32.mrb[6].mxu0 }
 0x5b1   :  { %v1362_v39 = vadd.f32 %v1402_v21, %v1361_v33  ;;  %v1560_v37 = vpop.f32.mrb[7].mxu0 }
 0x5b3   :  { %v1404_v40 = vmul.f32 -1.442695, %v1362_v39 }
 0x5b5   :  { %1751 = vpow2.f32 %v1404_v40 }
 0x5bf   :  { %v1752_v43 = vpop.eup %1751 }
 0x5c0   :  { %v1368_v60 = vadd.f32 1.0, %v1752_v43 }
 0x5c2   :  { %1753 = vrcp.f32 %v1368_v60 }
 0x5cc   :  { %v1754_v61 = vpop.eup %1753 }
 0x5cd   :  { %1372 = vst.msk [vmem:[#allocation4] sm:$0x3] %vm1371_vm14, %v1754_v61 }
 0x5ce   :  { %1766 = shalt.err (!%p1763_p4)
}
 0x5cf   :  { %s1767_s23 = scalar_lea.hbm %s2401_s9, 32 }
 0x5d0   :  { %p1768_p5 = scmp.ne.s32.totalorder %s2401_s9, %s1767_s23  ;;  %p1771_p6 = scmp.lt.u32.totalorder %s1767_s23, %s2401_s9 }
 0x5d2   :  { %p1773_p7 = pnand %p1771_p6, %p1768_p5 }
 0x5d4   :  { %1776 = shalt.err (!%p1773_p7)
}
 0x5d5   :  { %1382 = dma.vmem_to_hbm [thread:$0]  %s1380_s20, 32, %s2401_s9, [#allocation5]  }
 0x5d6   :  { %1777 = dma.done.wait [#allocation5], 32  }
 0x5d7   :  { %1778 = vsyncadd [#allocation5], 4294967264 }
 0x5d8   :  { %1386 = vsyncpa [#allocation5], 1 }

</bundles_post_ra>
